<compile_context>
chip_gen: v6e
topology: v6e:2x2x1
jax: 0.10.0
libtpu: 0.0.40
codegen_flags: <defaults>
</compile_context>

<pallas_src>
import jax
import jax.numpy as jnp
from jax.experimental import pallas as pl
from jax.experimental.pallas import tpu as pltpu

_LANES = 128
_SUBLANES = 8
_MAX_BLOCK_ROWS = 1024  # (1024, 128) f32 = 512 KiB per buffer


def _scale_add_kernel(x_ref, w_ref, b_ref, o_ref):
    # x_ref/o_ref: (block_rows, 128) in VMEM; w_ref/b_ref: (1,) scalars in SMEM.
    w = w_ref[0]
    b = b_ref[0]
    o_ref[...] = x_ref[...] * w + b


def generator_forward(x, weight, bias):
    """Pallas implementation of Generator.forward (nn.Linear(1, 1)).

    x:      (N, 1) float
    weight: (1, 1) float  (out_features, in_features)
    bias:   (1,)   float
    returns (N, 1) with y = x @ W.T + b
    """
    n, in_f = x.shape
    assert in_f == 1 and weight.shape == (1, 1) and bias.shape == (1,)

    # Repack (N, 1) -> lane-dense (rows, 128) slab.
    rows = pl.cdiv(n, _LANES)
    rows = ((rows + _SUBLANES - 1) // _SUBLANES) * _SUBLANES  # sublane align
    block_rows = min(rows, _MAX_BLOCK_ROWS)
    rows = ((rows + block_rows - 1) // block_rows) * block_rows  # tile align
    padded = rows * _LANES

    flat = jnp.zeros((padded,), dtype=x.dtype).at[:n].set(x.reshape(-1))
    slab = flat.reshape(rows, _LANES)

    w_flat = weight.reshape(-1).astype(x.dtype)
    b_flat = bias.reshape(-1).astype(x.dtype)

    grid = (rows // block_rows,)
    itemsize = jnp.dtype(x.dtype).itemsize

    out_slab = pl.pallas_call(
        _scale_add_kernel,
        out_shape=jax.ShapeDtypeStruct((rows, _LANES), x.dtype),
        grid_spec=pl.GridSpec(
            grid=grid,
            in_specs=[
                pl.BlockSpec((block_rows, _LANES), lambda i: (i, 0)),
                pl.BlockSpec(memory_space=pltpu.MemorySpace.SMEM),
                pl.BlockSpec(memory_space=pltpu.MemorySpace.SMEM),
            ],
            out_specs=pl.BlockSpec((block_rows, _LANES), lambda i: (i, 0)),
        ),
        compiler_params=pltpu.CompilerParams(
            dimension_semantics=("parallel",),
        ),
        cost_estimate=pl.CostEstimate(
            flops=2 * padded,
            transcendentals=0,
            bytes_accessed=2 * padded * itemsize,
        ),
    )(slab, w_flat, b_flat)

    return out_slab.reshape(-1)[:n].reshape(n, 1)


if __name__ == "__main__":
    key = jax.random.PRNGKey(0)

    # Deterministic parameter init mirroring the PyTorch module:
    #   nn.init.normal_(weight, mean=1.0, std=0.0) -> weight == 1.0
    #   nn.init.constant_(bias, 1.0)               -> bias   == 1.0
    weight = jnp.ones((1, 1), dtype=jnp.float32)
    bias = jnp.ones((1,), dtype=jnp.float32)

    # Primary small test: batch of 8 scalar inputs, shape (8, 1).
    x = jax.random.normal(key, (8, 1), dtype=jnp.float32)
    y = generator_forward(x, weight, bias)
    jax.block_until_ready(y)
    y_ref = x @ weight.T + bias
    assert y.shape == (8, 1)
    assert jnp.allclose(y, y_ref, atol=1e-6), (y, y_ref)

    # Secondary check exercising the multi-block (grid > 1) path with a
    # non-aligned length.
    k2 = jax.random.PRNGKey(1)
    x_big = jax.random.normal(k2, (262149, 1), dtype=jnp.float32)
    y_big = generator_forward(x_big, weight, bias)
    jax.block_until_ready(y_big)
    y_big_ref = x_big @ weight.T + bias
    assert y_big.shape == x_big.shape
    assert jnp.allclose(y_big, y_big_ref, atol=1e-6)

    print("KERNEL_OK")
</pallas_src>

<mosaic_0001>
module attributes {stable_mosaic.version = 11 : i64} {
  func.func @_scale_add_kernel(%arg0: i32, %arg1: memref<8x128xf32, #tpu.memory_space<vmem>>, %arg2: memref<1xf32, #tpu.memory_space<smem>>, %arg3: memref<1xf32, #tpu.memory_space<smem>>, %arg4: memref<8x128xf32, #tpu.memory_space<vmem>>) attributes {dimension_semantics = [#tpu.dimension_semantics<parallel>], iteration_bounds = array<i64: 1>, scalar_prefetch = 0 : i64, scratch_operands = 0 : i64, tpu.core_type = #tpu.core_type<tc>, window_params = [{transform_indices = @transform_0, window_bounds = array<i64: 8, 128>}, {transform_indices = @transform_1, window_bounds = array<i64: 1>}, {transform_indices = @transform_2, window_bounds = array<i64: 1>}, {transform_indices = @transform_3, window_bounds = array<i64: 8, 128>}]} {
    %c0 = arith.constant 0 : index
    %0 = memref.load %arg2[%c0] : memref<1xf32, #tpu.memory_space<smem>>
    %c0_0 = arith.constant 0 : index
    %1 = memref.load %arg3[%c0_0] : memref<1xf32, #tpu.memory_space<smem>>
    %c0_1 = arith.constant 0 : index
    %c0_2 = arith.constant 0 : index
    %2 = vector.load %arg1[%c0_1, %c0_2] : memref<8x128xf32, #tpu.memory_space<vmem>>, vector<8x128xf32>
    %3 = vector.broadcast %0 : f32 to vector<8x128xf32>
    %4 = arith.mulf %2, %3 : vector<8x128xf32>
    %5 = vector.broadcast %1 : f32 to vector<8x128xf32>
    %6 = arith.addf %4, %5 : vector<8x128xf32>
    %c0_3 = arith.constant 0 : index
    %c0_4 = arith.constant 0 : index
    %7 = vector.load %arg4[%c0_3, %c0_4] : memref<8x128xf32, #tpu.memory_space<vmem>>, vector<8x128xf32>
    tpu.vector_store %arg4[%c0_3, %c0_4], %6 {strides = array<i32>} : memref<8x128xf32, #tpu.memory_space<vmem>>, vector<8x128xf32>,
    return
  }
  func.func @transform_0(%arg0: i32) -> (i32, i32) {
    %c0_i32 = arith.constant 0 : i32
    %c0_i32_0 = arith.constant 0 : i32
    return %arg0, %c0_i32 : i32, i32
  }
  func.func @transform_1(%arg0: i32) -> i32 {
    %c0_i32 = arith.constant 0 : i32
    %c0_i32_0 = arith.constant 0 : i32
    return %c0_i32 : i32
  }
  func.func @transform_2(%arg0: i32) -> i32 {
    %c0_i32 = arith.constant 0 : i32
    %c0_i32_0 = arith.constant 0 : i32
    return %c0_i32 : i32
  }
  func.func @transform_3(%arg0: i32) -> (i32, i32) {
    %c0_i32 = arith.constant 0 : i32
    %c0_i32_0 = arith.constant 0 : i32
    return %arg0, %c0_i32 : i32, i32
  }
}

</mosaic_0001>

<bundles_post_ra>
// kernel: tpu_custom_call.1
= control target key start
LH: loop header
LB: loop body
LE: loop exit
PB: predicated region body
PF: predicated region fallthrough
CT: control target
= control target key end

     0   :  { %10 = vsyncpa [#allocation5], 0  ;;  %s132_s0 = inlined_call_operand.hbm [shape: f32[8,128], index: 0, kind: input, shape index: {}]   ;;  %s133_s1 = inlined_call_operand.<no memory space> [shape: f32[1], index: 1, kind: input, shape index: {}]   ;;  %s134_s2 = inlined_call_operand.<no memory space> [shape: f32[1], index: 2, kind: input, shape index: {}]   ;;  %s135_s3 = inlined_call_operand.hbm [shape: f32[8,128], index: 3, kind: output, shape index: {}]  }
   0x1   :  { %11 = vsyncpa [#allocation6], 0  ;;  %s98_s12 = smov [#allocation4]  }
   0x2   :  { %s18_s13 = sshll.u32 %s98_s12, 4  ;;  %s19_s13 = int_to_ptr.vmem [resolvable:$true] %s18_s13 }
   0x3   :  { %s62_s14 = scalar_lea.vmem %s19_s13, 128  ;;  %p67_p1 = scmp.lt.s32.totalorder %s19_s13, %s19_s13 }
   0x4   :  { %p63_p0 = scmp.ne.s32.totalorder %s19_s13, %s62_s14  ;;  %p68_p2 = scmp.lt.s32.totalorder %s62_s14, %s62_s14 }
   0x6   :  { %p69_p3 = por %p68_p2, %p67_p1 }
   0x8   :  { %p70_p4 = pnand %p69_p3, %p63_p0 }
   0xa   :  { %73 = shalt.err (!%p70_p4)
}
   0xb   :  { %21 = dma.hbm_to_vmem [thread:$0]  %s132_s0, 128, %s19_s13, [#allocation5]  }
   0xc   :  { %94 = dma.done.wait [#allocation5], 128  }
   0xd   :  { %95 = vsyncadd [#allocation5], 4294967168  ;;  %v32_v0 = vstv %s133_s1  ;;  %v31_v1 = vld [vmem:[#allocation4] sm:$0xff]  ;;  %v34_v2 = vstv %s134_s2  ;;  %s99_s21 = smov [#allocation7]  }
   0xe   :  { %s43_s22 = sshll.u32 %s99_s21, 4  ;;  %v33_v3 = vmul.f32 %v32_v0, %v31_v1  ;;  %s44_s22 = int_to_ptr.vmem [resolvable:$true] %s43_s22 }
   0xf   :  { %s74_s23 = scalar_lea.vmem %s44_s22, 128  ;;  %p79_p6 = scmp.lt.s32.totalorder %s44_s22, %s44_s22 }
  0x10   :  { %v35_v4 = vadd.f32 %v34_v2, %v33_v3  ;;  %p75_p5 = scmp.ne.s32.totalorder %s44_s22, %s74_s23  ;;  %p80_p7 = scmp.lt.s32.totalorder %s74_s23, %s74_s23 }
  0x12   :  { %36 = vst [vmem:[#allocation7] sm:$0xff] %v35_v4  ;;  %p81_p8 = por %p80_p7, %p79_p6 }
  0x14   :  { %p82_p9 = pnand %p81_p8, %p75_p5 }
  0x16   :  { %85 = shalt.err (!%p82_p9)
}
  0x17   :  { %46 = dma.vmem_to_hbm [thread:$0]  %s44_s22, 128, %s135_s3, [#allocation6]  }
  0x18   :  { %96 = dma.done.wait [#allocation6], 128  }
  0x19   :  { %97 = vsyncadd [#allocation6], 4294967168 }
  0x1a   :  { %50 = vsyncpa [#allocation5], 1 }
  0x1b   :  { %51 = vsyncpa [#allocation6], 1 }

</bundles_post_ra>
